<compile_context>
chip_gen: v6e
topology: v6e:2x2x1
jax: 0.10.0
libtpu: 0.0.40
codegen_flags: <defaults>
</compile_context>

<pallas_src>
import functools

import jax
import jax.numpy as jnp
from jax.experimental import pallas as pl
from jax.experimental.pallas import tpu as pltpu

LANE = 128


def _round_up(x, m):
    return ((x + m - 1) // m) * m


def _mlp_kernel(num_inner, x_ref, w_in_ref, b_in_ref, w_h_ref, b_h_ref,
                w_out_ref, b_out_ref, o_ref):
    """Fused MLP forward over one batch tile (all feature dims lane-dense).

    x_ref:     (TB, in_dim)
    w_in_ref:  (in_dim, Np)        b_in_ref:  (1, Np)
    w_h_ref:   (L-1, Np, Np)       b_h_ref:   (L-1, 1, Np)
    w_out_ref: (Np, out_pad)       b_out_ref: (1, out_pad)
    o_ref:     (TB, out_pad)
    """
    h = jnp.tanh(
        jnp.dot(x_ref[...], w_in_ref[...], preferred_element_type=jnp.float32)
        + b_in_ref[...])
    for l in range(num_inner):            # static unroll (num_inner is a Python int)
        h = jnp.tanh(
            jnp.dot(h, w_h_ref[l], preferred_element_type=jnp.float32)
            + b_h_ref[l])
    o_ref[...] = (
        jnp.dot(h, w_out_ref[...], preferred_element_type=jnp.float32)
        + b_out_ref[...]).astype(o_ref.dtype)


def _mlp_kernel_no_hidden(x_ref, w_in_ref, b_in_ref, w_out_ref, b_out_ref, o_ref):
    """Variant for hidden_layers == 1 (no inner Linear layers)."""
    h = jnp.tanh(
        jnp.dot(x_ref[...], w_in_ref[...], preferred_element_type=jnp.float32)
        + b_in_ref[...])
    o_ref[...] = (
        jnp.dot(h, w_out_ref[...], preferred_element_type=jnp.float32)
        + b_out_ref[...]).astype(o_ref.dtype)


def prepare_params(params):
    """One-time glue, kept out of the per-forward hot path.

    Input `params` uses PyTorch nn.Linear convention (out, in).
    Produces pre-transposed (in, out) weights with the hidden width padded to a
    lane-dense multiple of 128 and a lane-dense padded output layer.  Padding is
    exact: tanh(0)=0 and zero rows/columns contribute nothing.
    """
    N = params["in_w"].shape[0]
    out_dim = params["out_w"].shape[0]
    n_inner = int(params["num_inner"])
    N_pad = _round_up(N, LANE)
    out_pad = _round_up(out_dim, LANE)

    prepared = {
        "w_in": jnp.pad(params["in_w"].T, ((0, 0), (0, N_pad - N))),        # (in_dim, Np)
        "b_in": jnp.pad(params["in_b"], (0, N_pad - N)).reshape(1, N_pad),  # (1, Np)
        "w_out": jnp.pad(params["out_w"].T,                                 # (Np, out_pad)
                         ((0, N_pad - N), (0, out_pad - out_dim))),
        "b_out": jnp.pad(params["out_b"],
                         (0, out_pad - out_dim)).reshape(1, out_pad),
        "num_inner": n_inner,
        "out_dim": out_dim,
    }
    if n_inner > 0:
        w_h = jnp.transpose(params["h_w"], (0, 2, 1))                       # (L-1, N, N) (in,out)
        prepared["w_h"] = jnp.pad(
            w_h, ((0, 0), (0, N_pad - N), (0, N_pad - N)))                  # (L-1, Np, Np)
        prepared["b_h"] = jnp.pad(
            params["h_b"], ((0, 0), (0, N_pad - N))).reshape(n_inner, 1, N_pad)
    return prepared


@functools.partial(jax.jit,
                   static_argnames=("num_inner", "out_dim", "max_batch_tile"))
def _mlp_forward_impl(x, w_in, b_in, w_h, b_h, w_out, b_out, *,
                      num_inner, out_dim, max_batch_tile):
    B, in_dim = x.shape
    N_pad = w_in.shape[1]
    out_pad = w_out.shape[1]

    # Batch tiling: multiple of 8 sublanes, large tiles to amortize per-step
    # overhead, but always >= 2 tiles when B > 8 so v7x's second TC has work.
    B8 = _round_up(B, 8)
    if B8 <= 8:
        TB = B8
    else:
        half = _round_up((B8 + 1) // 2, 8)
        TB = min(max_batch_tile, half)
    Bp = _round_up(B, TB)
    if Bp != B:
        x = jnp.pad(x, ((0, Bp - B), (0, 0)))
    grid = (Bp // TB,)

    def resident(shape):
        # Same block every grid step -> weights stay VMEM-resident, one DMA.
        return pl.BlockSpec(shape, lambda b: tuple(0 for _ in shape))

    if num_inner > 0:
        kernel = functools.partial(_mlp_kernel, num_inner)
        operands = (x, w_in, b_in, w_h, b_h, w_out, b_out)
        in_specs = [
            pl.BlockSpec((TB, in_dim), lambda b: (b, 0)),
            resident((in_dim, N_pad)),
            resident((1, N_pad)),
            resident((num_inner, N_pad, N_pad)),
            resident((num_inner, 1, N_pad)),
            resident((N_pad, out_pad)),
            resident((1, out_pad)),
        ]
    else:
        kernel = _mlp_kernel_no_hidden
        operands = (x, w_in, b_in, w_out, b_out)
        in_specs = [
            pl.BlockSpec((TB, in_dim), lambda b: (b, 0)),
            resident((in_dim, N_pad)),
            resident((1, N_pad)),
            resident((N_pad, out_pad)),
            resident((1, out_pad)),
        ]

    itemsize = x.dtype.itemsize
    w_bytes = sum(int(a.size) for a in operands[1:]) * itemsize
    flops = 2 * Bp * (in_dim * N_pad + num_inner * N_pad * N_pad + N_pad * out_pad)
    transcendentals = Bp * N_pad * (num_inner + 1)
    bytes_accessed = int(Bp * in_dim * itemsize + w_bytes + Bp * out_pad * itemsize)

    # Resident weights (double-buffered by the pipeline) + 2x (x tile, out tile)
    # + activation temporaries, with headroom; clamp to [16 MiB, 64 MiB].
    vmem_limit = int(2 * w_bytes
                     + 4 * TB * (in_dim + out_pad) * itemsize
                     + 8 * TB * N_pad * itemsize
                     + (4 << 20))
    vmem_limit = max(min(vmem_limit, 64 << 20), 16 << 20)

    out = pl.pallas_call(
        kernel,
        out_shape=jax.ShapeDtypeStruct((Bp, out_pad), x.dtype),
        grid_spec=pltpu.PrefetchScalarGridSpec(
            num_scalar_prefetch=0,
            grid=grid,
            in_specs=in_specs,
            out_specs=pl.BlockSpec((TB, out_pad), lambda b: (b, 0)),
        ),
        compiler_params=pltpu.CompilerParams(
            dimension_semantics=("parallel",),   # 2-TC sharding on v7x
            vmem_limit_bytes=vmem_limit),
        cost_estimate=pl.CostEstimate(
            flops=flops,
            transcendentals=transcendentals,
            bytes_accessed=bytes_accessed),
    )(*operands)

    # Fused (under jit) strip of batch padding and output lane padding.
    return out[:B, :out_dim]


def mlp_forward(x, prepared, *, max_batch_tile=1024):
    """x: (B, in_dim) f32. Returns (B, out_dim)."""
    return _mlp_forward_impl(
        x,
        prepared["w_in"], prepared["b_in"],
        prepared.get("w_h"), prepared.get("b_h"),
        prepared["w_out"], prepared["b_out"],
        num_inner=prepared["num_inner"],
        out_dim=prepared["out_dim"],
        max_batch_tile=max_batch_tile)


def init_params(key, in_dim, out_dim, num_h_layers, num_neurons):
    """Deterministic synthetic init matching nn.Linear shapes (out, in)."""
    n_inner = max(int(num_h_layers) - 1, 0)
    keys = jax.random.split(key, 6)
    scale = 0.1
    return {
        "in_w": scale * jax.random.normal(keys[0], (num_neurons, in_dim), jnp.float32),
        "in_b": scale * jax.random.normal(keys[1], (num_neurons,), jnp.float32),
        "h_w": scale * jax.random.normal(keys[2], (n_inner, num_neurons, num_neurons), jnp.float32),
        "h_b": scale * jax.random.normal(keys[3], (n_inner, num_neurons), jnp.float32),
        "out_w": scale * jax.random.normal(keys[4], (out_dim, num_neurons), jnp.float32),
        "out_b": scale * jax.random.normal(keys[5], (out_dim,), jnp.float32),
        "num_inner": n_inner,
    }


def reference_forward(x, params):
    """Pure-JAX reference matching the PyTorch module semantics."""
    h = jnp.tanh(x @ params["in_w"].T + params["in_b"])
    for l in range(params["num_inner"]):
        h = jnp.tanh(h @ params["h_w"][l].T + params["h_b"][l])
    return h @ params["out_w"].T + params["out_b"]


if __name__ == "__main__":
    # Hyperparams implied by the module: {'hidden_layers': 3, 'neurons': 32}
    in_dim, out_dim = 16, 8
    num_neurons = 32
    batch = 2

    key = jax.random.PRNGKey(0)
    kx, kx2, kp1, kp2 = jax.random.split(key, 4)
    x = jax.random.normal(kx, (batch, in_dim), jnp.float32)

    # Main config: hidden_layers = 3  (2 inner layers).
    params3 = init_params(kp1, in_dim, out_dim, 3, num_neurons)
    prep3 = prepare_params(params3)
    out3 = jax.block_until_ready(mlp_forward(x, prep3))
    ref3 = reference_forward(x, params3)
    assert out3.shape == (batch, out_dim)
    assert jnp.allclose(out3, ref3, atol=1e-5, rtol=1e-5), (out3, ref3)

    # Larger batch: exercises batch padding and the >=2-tile grid path.
    xb = jax.random.normal(kx2, (200, in_dim), jnp.float32)
    outb = jax.block_until_ready(mlp_forward(xb, prep3))
    refb = reference_forward(xb, params3)
    assert outb.shape == (200, out_dim)
    assert jnp.allclose(outb, refb, atol=1e-5, rtol=1e-5)

    # Edge config: hidden_layers = 1 (no inner layers).
    params1 = init_params(kp2, in_dim, out_dim, 1, num_neurons)
    prep1 = prepare_params(params1)
    out1 = jax.block_until_ready(mlp_forward(x, prep1))
    ref1 = reference_forward(x, params1)
    assert out1.shape == (batch, out_dim)
    assert jnp.allclose(out1, ref1, atol=1e-5, rtol=1e-5), (out1, ref1)

    print("KERNEL_OK")
</pallas_src>

<mosaic_0001>
module attributes {stable_mosaic.version = 11 : i64} {
  func.func @_mlp_kernel(%arg0: i32, %arg1: memref<8x16xf32, #tpu.memory_space<vmem>>, %arg2: memref<16x128xf32, #tpu.memory_space<vmem>>, %arg3: memref<1x128xf32, #tpu.memory_space<vmem>>, %arg4: memref<2x128x128xf32, #tpu.memory_space<vmem>>, %arg5: memref<2x1x128xf32, #tpu.memory_space<vmem>>, %arg6: memref<128x128xf32, #tpu.memory_space<vmem>>, %arg7: memref<1x128xf32, #tpu.memory_space<vmem>>, %arg8: memref<8x128xf32, #tpu.memory_space<vmem>>) attributes {dimension_semantics = [#tpu.dimension_semantics<parallel>], iteration_bounds = array<i64: 1>, scalar_prefetch = 0 : i64, scratch_operands = 0 : i64, tpu.core_type = #tpu.core_type<tc>, window_params = [{transform_indices = @transform_0, window_bounds = array<i64: 8, 16>}, {pipeline_mode = #tpu.pipeline_mode<synchronous>, transform_indices = @transform_1, window_bounds = array<i64: 16, 128>}, {pipeline_mode = #tpu.pipeline_mode<synchronous>, transform_indices = @transform_2, window_bounds = array<i64: 1, 128>}, {pipeline_mode = #tpu.pipeline_mode<synchronous>, transform_indices = @transform_3, window_bounds = array<i64: 2, 128, 128>}, {pipeline_mode = #tpu.pipeline_mode<synchronous>, transform_indices = @transform_4, window_bounds = array<i64: 2, 1, 128>}, {pipeline_mode = #tpu.pipeline_mode<synchronous>, transform_indices = @transform_5, window_bounds = array<i64: 128, 128>}, {pipeline_mode = #tpu.pipeline_mode<synchronous>, transform_indices = @transform_6, window_bounds = array<i64: 1, 128>}, {transform_indices = @transform_7, window_bounds = array<i64: 8, 128>}]} {
    %c0 = arith.constant 0 : index
    %c0_0 = arith.constant 0 : index
    %0 = vector.load %arg1[%c0, %c0_0] : memref<8x16xf32, #tpu.memory_space<vmem>>, vector<8x16xf32>
    %c0_1 = arith.constant 0 : index
    %c0_2 = arith.constant 0 : index
    %1 = vector.load %arg2[%c0_1, %c0_2] : memref<16x128xf32, #tpu.memory_space<vmem>>, vector<16x128xf32>
    %cst = arith.constant dense<0.000000e+00> : vector<8x128xf32>
    %2 = tpu.matmul %0, %1, %cst {dimension_numbers = #tpu.dot_dimension_numbers<[1], [0], [0], [1], [0, 0, 1, 1], [], []>} : vector<8x16xf32>, vector<16x128xf32>, vector<8x128xf32> -> vector<8x128xf32>
    %c0_3 = arith.constant 0 : index
    %c0_4 = arith.constant 0 : index
    %3 = vector.load %arg3[%c0_3, %c0_4] : memref<1x128xf32, #tpu.memory_space<vmem>>, vector<1x128xf32>
    %4 = vector.broadcast %3 : vector<1x128xf32> to vector<8x128xf32>
    %5 = arith.addf %2, %4 : vector<8x128xf32>
    %6 = math.tanh %5 : vector<8x128xf32>
    %c0_5 = arith.constant 0 : index
    %c0_6 = arith.constant 0 : index
    %c0_7 = arith.constant 0 : index
    %7 = vector.load %arg4[%c0_5, %c0_6, %c0_7] : memref<2x128x128xf32, #tpu.memory_space<vmem>>, vector<1x128x128xf32>
    %8 = vector.shape_cast %7 : vector<1x128x128xf32> to vector<128x128xf32>
    %cst_8 = arith.constant dense<0.000000e+00> : vector<8x128xf32>
    %9 = tpu.matmul %6, %8, %cst_8 {dimension_numbers = #tpu.dot_dimension_numbers<[1], [0], [0], [1], [0, 0, 1, 1], [], []>} : vector<8x128xf32>, vector<128x128xf32>, vector<8x128xf32> -> vector<8x128xf32>
    %c0_9 = arith.constant 0 : index
    %c0_10 = arith.constant 0 : index
    %c0_11 = arith.constant 0 : index
    %10 = vector.load %arg5[%c0_9, %c0_10, %c0_11] : memref<2x1x128xf32, #tpu.memory_space<vmem>>, vector<1x1x128xf32>
    %11 = vector.shape_cast %10 : vector<1x1x128xf32> to vector<1x128xf32>
    %12 = vector.broadcast %11 : vector<1x128xf32> to vector<8x128xf32>
    %13 = arith.addf %9, %12 : vector<8x128xf32>
    %14 = math.tanh %13 : vector<8x128xf32>
    %c1 = arith.constant 1 : index
    %c0_12 = arith.constant 0 : index
    %c0_13 = arith.constant 0 : index
    %15 = vector.load %arg4[%c1, %c0_12, %c0_13] : memref<2x128x128xf32, #tpu.memory_space<vmem>>, vector<1x128x128xf32>
    %16 = vector.shape_cast %15 : vector<1x128x128xf32> to vector<128x128xf32>
    %cst_14 = arith.constant dense<0.000000e+00> : vector<8x128xf32>
    %17 = tpu.matmul %14, %16, %cst_14 {dimension_numbers = #tpu.dot_dimension_numbers<[1], [0], [0], [1], [0, 0, 1, 1], [], []>} : vector<8x128xf32>, vector<128x128xf32>, vector<8x128xf32> -> vector<8x128xf32>
    %c1_15 = arith.constant 1 : index
    %c0_16 = arith.constant 0 : index
    %c0_17 = arith.constant 0 : index
    %18 = vector.load %arg5[%c1_15, %c0_16, %c0_17] : memref<2x1x128xf32, #tpu.memory_space<vmem>>, vector<1x1x128xf32>
    %19 = vector.shape_cast %18 : vector<1x1x128xf32> to vector<1x128xf32>
    %20 = vector.broadcast %19 : vector<1x128xf32> to vector<8x128xf32>
    %21 = arith.addf %17, %20 : vector<8x128xf32>
    %22 = math.tanh %21 : vector<8x128xf32>
    %c0_18 = arith.constant 0 : index
    %c0_19 = arith.constant 0 : index
    %23 = vector.load %arg6[%c0_18, %c0_19] : memref<128x128xf32, #tpu.memory_space<vmem>>, vector<128x128xf32>
    %cst_20 = arith.constant dense<0.000000e+00> : vector<8x128xf32>
    %24 = tpu.matmul %22, %23, %cst_20 {dimension_numbers = #tpu.dot_dimension_numbers<[1], [0], [0], [1], [0, 0, 1, 1], [], []>} : vector<8x128xf32>, vector<128x128xf32>, vector<8x128xf32> -> vector<8x128xf32>
    %c0_21 = arith.constant 0 : index
    %c0_22 = arith.constant 0 : index
    %25 = vector.load %arg7[%c0_21, %c0_22] : memref<1x128xf32, #tpu.memory_space<vmem>>, vector<1x128xf32>
    %26 = vector.broadcast %25 : vector<1x128xf32> to vector<8x128xf32>
    %27 = arith.addf %24, %26 : vector<8x128xf32>
    %c0_23 = arith.constant 0 : index
    %c0_24 = arith.constant 0 : index
    %28 = vector.load %arg8[%c0_23, %c0_24] : memref<8x128xf32, #tpu.memory_space<vmem>>, vector<8x128xf32>
    tpu.vector_store %arg8[%c0_23, %c0_24], %27 {strides = array<i32>} : memref<8x128xf32, #tpu.memory_space<vmem>>, vector<8x128xf32>,
    return
  }
  func.func @transform_0(%arg0: i32) -> (i32, i32) {
    %c0_i32 = arith.constant 0 : i32
    %c0_i32_0 = arith.constant 0 : i32
    return %arg0, %c0_i32 : i32, i32
  }
  func.func @transform_1(%arg0: i32) -> (i32, i32) {
    %c0_i32 = arith.constant 0 : i32
    %c0_i32_0 = arith.constant 0 : i32
    %c0_i32_1 = arith.constant 0 : i32
    return %c0_i32, %c0_i32_0 : i32, i32
  }
  func.func @transform_2(%arg0: i32) -> (i32, i32) {
    %c0_i32 = arith.constant 0 : i32
    %c0_i32_0 = arith.constant 0 : i32
    %c0_i32_1 = arith.constant 0 : i32
    return %c0_i32, %c0_i32_0 : i32, i32
  }
  func.func @transform_3(%arg0: i32) -> (i32, i32, i32) {
    %c0_i32 = arith.constant 0 : i32
    %c0_i32_0 = arith.constant 0 : i32
    %c0_i32_1 = arith.constant 0 : i32
    %c0_i32_2 = arith.constant 0 : i32
    return %c0_i32, %c0_i32_0, %c0_i32_1 : i32, i32, i32
  }
  func.func @transform_4(%arg0: i32) -> (i32, i32, i32) {
    %c0_i32 = arith.constant 0 : i32
    %c0_i32_0 = arith.constant 0 : i32
    %c0_i32_1 = arith.constant 0 : i32
    %c0_i32_2 = arith.constant 0 : i32
    return %c0_i32, %c0_i32_0, %c0_i32_1 : i32, i32, i32
  }
  func.func @transform_5(%arg0: i32) -> (i32, i32) {
    %c0_i32 = arith.constant 0 : i32
    %c0_i32_0 = arith.constant 0 : i32
    %c0_i32_1 = arith.constant 0 : i32
    return %c0_i32, %c0_i32_0 : i32, i32
  }
  func.func @transform_6(%arg0: i32) -> (i32, i32) {
    %c0_i32 = arith.constant 0 : i32
    %c0_i32_0 = arith.constant 0 : i32
    %c0_i32_1 = arith.constant 0 : i32
    return %c0_i32, %c0_i32_0 : i32, i32
  }
  func.func @transform_7(%arg0: i32) -> (i32, i32) {
    %c0_i32 = arith.constant 0 : i32
    %c0_i32_0 = arith.constant 0 : i32
    return %arg0, %c0_i32 : i32, i32
  }
}

</mosaic_0001>

<bundles_post_ra>
// kernel: _mlp_forward_impl.1
= control target key start
LH: loop header
LB: loop body
LE: loop exit
PB: predicated region body
PF: predicated region fallthrough
CT: control target
= control target key end

     0   :  { %12 = vsyncpa [#allocation3], 0  ;;  %s823_s0 = inlined_call_operand.vmem [shape: f32[8,16], index: 0, kind: input, shape index: {}]   ;;  %s824_s1 = inlined_call_operand.hbm [shape: f32[16,128], index: 1, kind: input, shape index: {}]   ;;  %s825_s2 = inlined_call_operand.vmem [shape: f32[1,128], index: 2, kind: input, shape index: {}]   ;;  %s826_s3 = inlined_call_operand.hbm [shape: f32[2,128,128], index: 3, kind: input, shape index: {}]   ;;  %s827_s4 = inlined_call_operand.vmem [shape: f32[2,1,128], index: 4, kind: input, shape index: {}]   ;;  %s828_s5 = inlined_call_operand.hbm [shape: f32[128,128], index: 5, kind: input, shape index: {}]   ;;  %s829_s6 = inlined_call_operand.vmem [shape: f32[1,128], index: 6, kind: input, shape index: {}]   ;;  %s830_s7 = inlined_call_operand.vmem [shape: f32[8,128], index: 7, kind: output, shape index: {}]  }
   0x1   :  { %13 = vsyncpa [#allocation5], 0  ;;  %s691_s24 = smov [#allocation4]   ;;  %s692_s26 = smov [#allocation2]  }
   0x2   :  { %s35_s25 = sshll.u32 %s691_s24, 4  ;;  %s21_s27 = sshll.u32 %s692_s26, 4  ;;  %s36_s25 = int_to_ptr.vmem [resolvable:$true] %s35_s25  ;;  %s22_s27 = int_to_ptr.vmem [resolvable:$true] %s21_s27 }
   0x3   :  { %s635_s28 = scalar_lea.vmem %s36_s25, 4096  ;;  %p640_p1 = scmp.lt.s32.totalorder %s36_s25, %s36_s25 }
   0x4   :  { %p636_p0 = scmp.ne.s32.totalorder %s36_s25, %s635_s28  ;;  %p641_p2 = scmp.lt.s32.totalorder %s635_s28, %s635_s28 }
   0x6   :  { %p642_p3 = por %p641_p2, %p640_p1 }
   0x8   :  { %p643_p4 = pnand %p642_p3, %p636_p0 }
   0xa   :  { %646 = shalt.err (!%p643_p4)
}
   0xb   :  { %s693_s29 = smov 128   ;;  %s694_s30 = smov 8  }
   0xc   :  { %41 = dma.hbm_to_vmem [thread:$0]  %s826_s3, 4096, %s36_s25, [#allocation5], %s693_s29, %s693_s29, %s694_s30  }
   0xd   :  { %s655_s10 = scalar_lea.vmem %s22_s27, 256  ;;  %p660_p6 = scmp.lt.s32.totalorder %s22_s27, %s22_s27 }
   0xe   :  { %p656_p5 = scmp.ne.s32.totalorder %s22_s27, %s655_s10  ;;  %p661_p7 = scmp.lt.s32.totalorder %s655_s10, %s655_s10 }
  0x10   :  { %p662_p8 = por %p661_p7, %p660_p6 }
  0x12   :  { %p663_p9 = pnand %p662_p8, %p656_p5 }
  0x14   :  { %666 = shalt.err (!%p663_p9)
}
  0x15   :  { %27 = dma.hbm_to_vmem [thread:$0]  %s824_s1, 256, %s22_s27, [#allocation3], %s693_s29, %s693_s29, %s694_s30  }
  0x16   :  { %s695_s13 = smov [#allocation6]  }
  0x17   :  { %s49_s14 = sshll.u32 %s695_s13, 4  ;;  %s50_s14 = int_to_ptr.vmem [resolvable:$true] %s49_s14 }
  0x18   :  { %s675_s15 = scalar_lea.vmem %s50_s14, 2048  ;;  %p680_p11 = scmp.lt.s32.totalorder %s50_s14, %s50_s14 }
  0x19   :  { %p676_p10 = scmp.ne.s32.totalorder %s50_s14, %s675_s15  ;;  %p681_p12 = scmp.lt.s32.totalorder %s675_s15, %s675_s15 }
  0x1b   :  { %p682_p13 = por %p681_p12, %p680_p11 }
  0x1d   :  { %p683_p0 = pnand %p682_p13, %p676_p10 }
  0x1f   :  { %686 = shalt.err (!%p683_p0)
}
  0x20   :  { %55 = dma.hbm_to_vmem [thread:$0]  %s828_s5, 2048, %s50_s14, [#allocation5], %s693_s29, %s693_s29, %s694_s30  }
  0x21   :  { %687 = dma.done.wait [#allocation3], 256  }
  0x22   :  { %688 = vsyncadd [#allocation3], 4294967040 }
  0x23   :  { %689 = dma.done.wait [#allocation5], 6144  }
  0x24   :  { %690 = vsyncadd [#allocation5], 4294961152  ;;  %v696_v0 = vmov 0.0   ;;  %vm697_vm0 = vmmov 0   ;;  %v69_v1 = vld [vmem:[#allocation2 + $0x8] sm:$0xff]  ;;  %v68_v2 = vld [vmem:[#allocation2] sm:$0xff] }
  0x25   :  { %502 = vmatprep.subr.mxu0 %v696_v0  ;;  %506 = vmatprep.mubr.msk.f32.mxu0 %vm697_vm0, %v696_v0  ;;  %v67_v3 = vld [vmem:[%s823_s0] sm:$0xff]  ;;  %vm77_vm1 = vcmask 130048   ;;  %v167_v4 = vld [vmem:[#allocation4 + $0x78] sm:$0xff]  ;;  %v165_v6 = vld [vmem:[#allocation4 + $0x68] sm:$0xff] }
  0x26   :  { %509 = vmatprep.subr.mxu1 %v696_v0  ;;  %541 = vmatprep.mubr.msk.f32.mxu1 %vm697_vm0, %v696_v0  ;;  %v166_v5 = vld [vmem:[#allocation4 + $0x70] sm:$0xff]  ;;  %v164_v7 = vld [vmem:[#allocation4 + $0x60] sm:$0xff]  ;;  %v163_v8 = vld [vmem:[#allocation4 + $0x58] sm:$0xff] }
  0x27   :  { %503 = vmatpush3.msra.mxu0 %v69_v1  ;;  %510 = vmatpush3.msra.mxu1 %v167_v4  ;;  %v162_v9 = vld [vmem:[#allocation4 + $0x50] sm:$0xff]  ;;  %v161_v10 = vld [vmem:[#allocation4 + $0x48] sm:$0xff]  ;;  %v160_v11 = vld [vmem:[#allocation4 + $0x40] sm:$0xff] }
  0x28   :  { %504 = vmatprep.subr.mxu0 %v696_v0  ;;  %511 = vmatprep.subr.mxu1 %v696_v0  ;;  %v159_v12 = vld [vmem:[#allocation4 + $0x38] sm:$0xff]  ;;  %v158_v13 = vld [vmem:[#allocation4 + $0x30] sm:$0xff]  ;;  %v157_v14 = vld [vmem:[#allocation4 + $0x28] sm:$0xff] }
  0x29   :  { %505 = vmatpush3.msra.mxu0 %v68_v2  ;;  %512 = vmatpush3.msra.mxu1 %v166_v5  ;;  %v156_v15 = vld [vmem:[#allocation4 + $0x20] sm:$0xff]  ;;  %v155_v16 = vld [vmem:[#allocation4 + $0x18] sm:$0xff]  ;;  %v154_v17 = vld [vmem:[#allocation4 + $0x10] sm:$0xff] }
  0x2a   :  { %507 = vmatmul.mubr.msk.f32.vlgmr.msra.gmra.mxu0 %vm77_vm1, %v67_v3  ;;  %513 = vmatprep.subr.mxu1 %v696_v0  ;;  %v153_v18 = vld [vmem:[#allocation4 + $0x8] sm:$0xff]  ;;  %v152_v19 = vld [vmem:[#allocation4] sm:$0xff]  ;;  %v262_v20 = vld [vmem:[#allocation4 + $0xf8] sm:$0xff] }
  0x2b   :  { %544 = vmatprep.subr.mxu0 %v696_v0  ;;  %514 = vmatpush3.msra.mxu1 %v165_v6  ;;  %v261_v21 = vld [vmem:[#allocation4 + $0xf0] sm:$0xff]  ;;  %v260_v22 = vld [vmem:[#allocation4 + $0xe8] sm:$0xff]  ;;  %v259_v23 = vld [vmem:[#allocation4 + $0xe0] sm:$0xff] }
  0x2c   :  { %576 = vmatprep.mubr.msk.f32.mxu0 %vm697_vm0, %v696_v0  ;;  %515 = vmatprep.subr.mxu1 %v696_v0  ;;  %v258_v24 = vld [vmem:[#allocation4 + $0xd8] sm:$0xff]  ;;  %v257_v25 = vld [vmem:[#allocation4 + $0xd0] sm:$0xff]  ;;  %v256_v26 = vld [vmem:[#allocation4 + $0xc8] sm:$0xff] }
  0x2d   :  { %516 = vmatpush3.msra.mxu1 %v164_v7  ;;  %545 = vmatpush3.msra.mxu0 %v262_v20  ;;  %v442_v27 = vld [vmem:[%s825_s2] ss:$0 sm:$0xff]  ;;  %v255_v32 = vld [vmem:[#allocation4 + $0xc0] sm:$0xff]  ;;  %v254_v33 = vld [vmem:[#allocation4 + $0xb8] sm:$0xff] }
  0x2e   :  { %517 = vmatprep.subr.mxu1 %v696_v0  ;;  %546 = vmatprep.subr.mxu0 %v696_v0  ;;  %v253_v34 = vld [vmem:[#allocation4 + $0xb0] sm:$0xff]  ;;  %v252_v35 = vld [vmem:[#allocation4 + $0xa8] sm:$0xff]  ;;  %v251_v36 = vld [vmem:[#allocation4 + $0xa0] sm:$0xff] }
  0x2f   :  { %518 = vmatpush3.msra.mxu1 %v163_v8  ;;  %547 = vmatpush3.msra.mxu0 %v261_v21  ;;  %v250_v37 = vld [vmem:[#allocation4 + $0x98] sm:$0xff]  ;;  %v249_v38 = vld [vmem:[#allocation4 + $0x90] sm:$0xff]  ;;  %v248_v39 = vld [vmem:[#allocation4 + $0x88] sm:$0xff] }
  0x30   :  { %519 = vmatprep.subr.mxu1 %v696_v0  ;;  %548 = vmatprep.subr.mxu0 %v696_v0  ;;  %v247_v40 = vld [vmem:[#allocation4 + $0x80] sm:$0xff]  ;;  %v357_v41 = vld [vmem:[#allocation6 + $0x78] sm:$0xff]  ;;  %v356_v42 = vld [vmem:[#allocation6 + $0x70] sm:$0xff] }
  0x31   :  { %520 = vmatpush3.msra.mxu1 %v162_v9  ;;  %549 = vmatpush3.msra.mxu0 %v260_v22  ;;  %v355_v43 = vld [vmem:[#allocation6 + $0x68] sm:$0xff]  ;;  %v354_v44 = vld [vmem:[#allocation6 + $0x60] sm:$0xff]  ;;  %v353_v45 = vld [vmem:[#allocation6 + $0x58] sm:$0xff] }
  0x32   :  { %521 = vmatprep.subr.mxu1 %v696_v0  ;;  %550 = vmatprep.subr.mxu0 %v696_v0  ;;  %v352_v46 = vld [vmem:[#allocation6 + $0x50] sm:$0xff]  ;;  %v351_v47 = vld [vmem:[#allocation6 + $0x48] sm:$0xff]  ;;  %v350_v53 = vld [vmem:[#allocation6 + $0x40] sm:$0xff] }
  0x33   :  { %522 = vmatpush3.msra.mxu1 %v161_v10  ;;  %551 = vmatpush3.msra.mxu0 %v259_v23  ;;  %v444_v48 = vld [vmem:[%s827_s4] ss:$0 sm:$0xff]  ;;  %v349_v54 = vld [vmem:[#allocation6 + $0x38] sm:$0xff]  ;;  %v347_v56 = vld [vmem:[#allocation6 + $0x28] sm:$0xff] }
  0x34   :  { %523 = vmatprep.subr.mxu1 %v696_v0  ;;  %552 = vmatprep.subr.mxu0 %v696_v0  ;;  %v348_v55 = vld [vmem:[#allocation6 + $0x30] sm:$0xff]  ;;  %v346_v57 = vld [vmem:[#allocation6 + $0x20] sm:$0xff]  ;;  %v345_v58 = vld [vmem:[#allocation6 + $0x18] sm:$0xff] }
  0x35   :  { %524 = vmatpush3.msra.mxu1 %v160_v11  ;;  %553 = vmatpush3.msra.mxu0 %v258_v24  ;;  %v344_v59 = vld [vmem:[#allocation6 + $0x10] sm:$0xff]  ;;  %v343_v60 = vld [vmem:[#allocation6 + $0x8] sm:$0xff]  ;;  %v342_v61 = vld [vmem:[#allocation6] sm:$0xff] }
  0x36   :  { %525 = vmatprep.subr.mxu1 %v696_v0  ;;  %554 = vmatprep.subr.mxu0 %v696_v0  ;;  %v446_v62 = vld [vmem:[%s827_s4 + $0x1] ss:$0 sm:$0xff]  ;;  %v447_v4 = vld [vmem:[%s829_s6] ss:$0 sm:$0xff] }
  0x37   :  { %526 = vmatpush3.msra.mxu1 %v159_v12  ;;  %555 = vmatpush3.msra.mxu0 %v257_v25 }
  0x38   :  { %527 = vmatprep.subr.mxu1 %v696_v0  ;;  %556 = vmatprep.subr.mxu0 %v696_v0 }
  0x39   :  { %528 = vmatpush3.msra.mxu1 %v158_v13  ;;  %557 = vmatpush3.msra.mxu0 %v256_v26 }
  0x3a   :  { %529 = vmatprep.subr.mxu1 %v696_v0  ;;  %558 = vmatprep.subr.mxu0 %v696_v0 }
  0x3b   :  { %530 = vmatpush3.msra.mxu1 %v157_v14  ;;  %559 = vmatpush3.msra.mxu0 %v255_v32 }
  0x3c   :  { %531 = vmatprep.subr.mxu1 %v696_v0  ;;  %560 = vmatprep.subr.mxu0 %v696_v0 }
  0x3d   :  { %532 = vmatpush3.msra.mxu1 %v156_v15  ;;  %561 = vmatpush3.msra.mxu0 %v254_v33 }
  0x3e   :  { %533 = vmatprep.subr.mxu1 %v696_v0  ;;  %562 = vmatprep.subr.mxu0 %v696_v0 }
  0x3f   :  { %534 = vmatpush3.msra.mxu1 %v155_v16  ;;  %563 = vmatpush3.msra.mxu0 %v253_v34 }
  0x40   :  { %535 = vmatprep.subr.mxu1 %v696_v0  ;;  %564 = vmatprep.subr.mxu0 %v696_v0 }
  0x41   :  { %536 = vmatpush3.msra.mxu1 %v154_v17  ;;  %565 = vmatpush3.msra.mxu0 %v252_v35 }
  0x42   :  { %537 = vmatprep.subr.mxu1 %v696_v0  ;;  %566 = vmatprep.subr.mxu0 %v696_v0 }
  0x43   :  { %538 = vmatpush3.msra.mxu1 %v153_v18  ;;  %567 = vmatpush3.msra.mxu0 %v251_v36 }
  0x44   :  { %539 = vmatprep.subr.mxu1 %v696_v0  ;;  %568 = vmatprep.subr.mxu0 %v696_v0 }
  0x45   :  { %540 = vmatpush3.msra.mxu1 %v152_v19  ;;  %569 = vmatpush3.msra.mxu0 %v250_v37 }
  0x46   :  { %579 = vmatprep.subr.mxu1 %v696_v0  ;;  %570 = vmatprep.subr.mxu0 %v696_v0 }
  0x47   :  { %571 = vmatpush3.msra.mxu0 %v249_v38 }
  0x48   :  { %572 = vmatprep.subr.mxu0 %v696_v0 }
  0x49   :  { %573 = vmatpush3.msra.mxu0 %v248_v39 }
  0x4a   :  { %574 = vmatprep.subr.mxu0 %v696_v0 }
  0x4b   :  { %575 = vmatpush3.msra.mxu0 %v247_v40 }
  0xea   :  { %v147_v28 = vpop.f32.mrf.mxu0 }
  0xeb   :  { %v148_v29 = vadd.f32 %v442_v27, %v147_v28 }
  0xec   :  { %v508_v30 = vpop.f32.mrf.mxu0 }
  0xed   :  { %621 = vtanh.f32 %v148_v29 }
  0xfa   :  { %v622_v31 = vpop.eup %621 }
  0xfb   :  { %542 = vmatmul.mubr.f32.vlgmr.msra.gmra.mxu1 %v622_v31 }
  0xfc   :  { %611 = vmatprep.mubr.msk.f32.mxu1 %vm697_vm0, %v696_v0  ;;  %580 = vmatpush3.msra.mxu1 %v357_v41 }
  0xfd   :  { %581 = vmatprep.subr.mxu1 %v696_v0 }
  0xfe   :  { %582 = vmatpush3.msra.mxu1 %v356_v42 }
  0xff   :  { %583 = vmatprep.subr.mxu1 %v696_v0 }
 0x100   :  { %584 = vmatpush3.msra.mxu1 %v355_v43 }
 0x101   :  { %585 = vmatprep.subr.mxu1 %v696_v0 }
 0x102   :  { %586 = vmatpush3.msra.mxu1 %v354_v44 }
 0x103   :  { %587 = vmatprep.subr.mxu1 %v696_v0 }
 0x104   :  { %588 = vmatpush3.msra.mxu1 %v353_v45 }
 0x105   :  { %589 = vmatprep.subr.mxu1 %v696_v0 }
 0x106   :  { %590 = vmatpush3.msra.mxu1 %v352_v46 }
 0x107   :  { %591 = vmatprep.subr.mxu1 %v696_v0 }
 0x108   :  { %592 = vmatpush3.msra.mxu1 %v351_v47 }
 0x109   :  { %593 = vmatprep.subr.mxu1 %v696_v0 }
 0x10a   :  { %594 = vmatpush3.msra.mxu1 %v350_v53 }
 0x10b   :  { %595 = vmatprep.subr.mxu1 %v696_v0 }
 0x10c   :  { %596 = vmatpush3.msra.mxu1 %v349_v54 }
 0x10d   :  { %597 = vmatprep.subr.mxu1 %v696_v0 }
 0x10e   :  { %598 = vmatpush3.msra.mxu1 %v348_v55 }
 0x10f   :  { %599 = vmatprep.subr.mxu1 %v696_v0 }
 0x110   :  { %600 = vmatpush3.msra.mxu1 %v347_v56 }
 0x111   :  { %601 = vmatprep.subr.mxu1 %v696_v0 }
 0x112   :  { %602 = vmatpush3.msra.mxu1 %v346_v57 }
 0x113   :  { %603 = vmatprep.subr.mxu1 %v696_v0 }
 0x114   :  { %604 = vmatpush3.msra.mxu1 %v345_v58 }
 0x115   :  { %605 = vmatprep.subr.mxu1 %v696_v0 }
 0x116   :  { %606 = vmatpush3.msra.mxu1 %v344_v59 }
 0x117   :  { %607 = vmatprep.subr.mxu1 %v696_v0 }
 0x118   :  { %608 = vmatpush3.msra.mxu1 %v343_v60 }
 0x119   :  { %609 = vmatprep.subr.mxu1 %v696_v0 }
 0x11a   :  { %610 = vmatpush3.msra.mxu1 %v342_v61 }
 0x1bb   :  { %v241_v49 = vpop.f32.mrf.mxu1 }
 0x1bc   :  { %v242_v50 = vadd.f32 %v444_v48, %v241_v49 }
 0x1bd   :  { %v543_v51 = vpop.f32.mrf.mxu1 }
 0x1be   :  { %623 = vtanh.f32 %v242_v50 }
 0x1cb   :  { %v624_v52 = vpop.eup %623 }
 0x1cc   :  { %577 = vmatmul.mubr.f32.vlgmr.msra.gmra.mxu0 %v624_v52 }
 0x28c   :  { %v337_v63 = vpop.f32.mrf.mxu0 }
 0x28d   :  { %v338_v1 = vadd.f32 %v446_v62, %v337_v63 }
 0x28e   :  { %v578_v2 = vpop.f32.mrf.mxu0 }
 0x28f   :  { %625 = vtanh.f32 %v338_v1 }
 0x29c   :  { %v626_v3 = vpop.eup %625 }
 0x29d   :  { %612 = vmatmul.mubr.f32.vlgmr.msra.gmra.mxu1 %v626_v3 }
 0x35d   :  { %v431_v5 = vpop.f32.mrf.mxu1 }
 0x35e   :  { %v432_v6 = vadd.f32 %v447_v4, %v431_v5 }
 0x35f   :  { %v613_v7 = vpop.f32.mrf.mxu1 }
 0x360   :  { %435 = vst [vmem:[%s830_s7] sm:$0xff] %v432_v6 }
 0x361   :  { %440 = vsyncpa [#allocation3], 1 }
 0x362   :  { %441 = vsyncpa [#allocation5], 1 }

</bundles_post_ra>
